<compile_context>
chip_gen: v7x
topology: tpu7x:2x2x1
jax: 0.10.0
libtpu: 0.0.40
codegen_flags: <defaults>
</compile_context>

<pallas_src>
import functools

import jax
import jax.numpy as jnp
from jax.experimental import pallas as pl
from jax.experimental.pallas import tpu as pltpu


def _round_up(x, m):
    return (x + m - 1) // m * m


def _mlp_kernel(x_ref, w12_ref, b12_ref, bn1s_ref, bn1h_ref, w3_ref, o_ref,
                *, hp):
    x = x_ref[...].astype(jnp.bfloat16)                      # (TB, D)

    # Fused fc1 | fc2 | fc4 matmul on the MXU (bn2 scale folded into the fc2
    # columns; fc1/fc2/fc4 biases and bn2/bn3 shifts folded into b12).
    h = jnp.dot(x, w12_ref[...], preferred_element_type=jnp.float32)
    h = h + b12_ref[...]                                     # (TB, 2*Hp+128)

    h1 = h[:, :hp]                   # fc1(x) + b1
    x2 = h[:, hp:2 * hp]             # bn2(fc2(x))
    x5 = h[:, 2 * hp:2 * hp + 1]     # fc4(x) + b4 + (b3*bn3s + bn3h) fold

    # x1 = bn1(silu(fc1(x)))  -- exact sigmoid (exp + divide ride the EUP).
    sig = 1.0 / (1.0 + jnp.exp(-h1))
    x1 = (h1 * sig) * bn1s_ref[...] + bn1h_ref[...]

    # x3 = dropout(x1 * x2) -- identity in eval mode.
    x3 = x1 * x2

    # fc3 (bn3 scale folded into the row): VPU multiply + XLU lane reduce.
    x4 = jnp.sum(x3 * w3_ref[...], axis=-1, keepdims=True)

    # TODO(synk): lane-dense (1, TB) output via an in-kernel transpose was
    # skipped; the (TB, 1) writeback is a tiny fraction of the tile traffic.
    o_ref[...] = (x4 + x5).astype(o_ref.dtype)


def prepare_params(params, eps=1e-5):
    """One-time weight prep: transpose, BN/bias folding, padding, bf16 cast."""
    H, D = params["fc1_w"].shape
    Hp = _round_up(H, 128)
    N = 2 * Hp + 128              # [ fc1 | fc2 (bn2-folded) | fc4 column ]

    def bn_fold(gamma, beta, mean, var):
        scale = gamma / jnp.sqrt(var + eps)
        return scale, beta - mean * scale

    bn1s, bn1h = bn_fold(*params["bn1"])
    bn2s, bn2h = bn_fold(*params["bn2"])
    bn3s, bn3h = bn_fold(*params["bn3"])

    w1t = params["fc1_w"].T                          # (D, H)
    w2t = params["fc2_w"].T * bn2s[None, :]          # fold bn2 scale
    b2f = params["fc2_b"] * bn2s + bn2h              # fold bn2 into fc2 bias
    # fc4 column's bias also absorbs fc3's bias through bn3 and bn3's shift.
    c4 = params["fc4_b"][0] + params["fc3_b"][0] * bn3s[0] + bn3h[0]

    w12 = jnp.zeros((D, N), jnp.float32)
    w12 = (w12.at[:, :H].set(w1t)
               .at[:, Hp:Hp + H].set(w2t)
               .at[:, 2 * Hp].set(params["fc4_w"][0]))
    b12 = jnp.zeros((1, N), jnp.float32)
    b12 = (b12.at[0, :H].set(params["fc1_b"])
               .at[0, Hp:Hp + H].set(b2f)
               .at[0, 2 * Hp].set(c4))

    bn1s_p = jnp.zeros((1, Hp), jnp.float32).at[0, :H].set(bn1s)
    bn1h_p = jnp.zeros((1, Hp), jnp.float32).at[0, :H].set(bn1h)
    w3row = jnp.zeros((1, Hp), jnp.float32).at[0, :H].set(
        params["fc3_w"][0] * bn3s[0])

    return {
        "D": D, "H": H, "Hp": Hp, "N": N,
        "w12": w12.astype(jnp.bfloat16),
        "b12": b12, "bn1s": bn1s_p, "bn1h": bn1h_p, "w3": w3row,
    }


def _pick_tile(D, Hp, N, requested_tb=None):
    """Generation-aware batch tile size and VMEM limit."""
    try:
        vmem = int(pltpu.get_tpu_info().vmem_capacity_bytes)
    except Exception:
        vmem = 64 * 1024 * 1024                       # conservative (v7x-sized)
    two_tc = vmem <= 96 * 1024 * 1024                 # v7x: 64 MiB VMEM, 2 TCs
    vmem_limit = min(vmem * 3 // 4, 100 * 1024 * 1024)
    tb_target = requested_tb if requested_tb is not None else (
        512 if two_tc else 2048)
    # Single-buffered resident weights + folded vectors (bytes).
    resident = D * N * 2 + 4 * (N + 3 * Hp)
    # Per-batch-row VMEM: double-buffered f32 x tile + ~5 f32 N-wide temps.
    per_row = 2 * D * 4 + 5 * N * 4
    # TODO(synk): for very large hidden dims where w12 no longer fits VMEM
    # residency, add an Hp grid axis with an x4/x5 accumulator instead of
    # shrinking TB.
    tb_fit = max(8, (vmem_limit - resident) * 7 // (8 * per_row))
    tb = max(8, min(tb_target, tb_fit) // 8 * 8)
    return tb, two_tc, vmem_limit


def mlp_forward(x, prepped, *, tb=None):
    """x: (B, input_dim) f32 (unpadded).  prepped: output of prepare_params."""
    B, D = x.shape
    Hp, N = prepped["Hp"], prepped["N"]
    assert D == prepped["D"]

    TB, two_tc, vmem_limit = _pick_tile(D, Hp, N, tb)
    # Never make the tile larger than the batch (keep a multiple of 8 rows).
    TB = min(TB, max(8, (B // 8) * 8))
    # v7x: ensure the "parallel" grid axis has >= 2 steps when the batch
    # allows it, so both TensorCores get work.
    if two_tc and B > 8 and -(-B // TB) < 2:
        TB = max(8, _round_up(-(-B // 2), 8))
    grid = (-(-B // TB),)              # cdiv; last block may be partial

    def resident(shape, single):
        if single:
            return pl.BlockSpec(shape, lambda i: (0, 0),
                                pipeline_mode=pl.Buffered(1))
        return pl.BlockSpec(shape, lambda i: (0, 0))

    flops = 2 * B * D * N + 12 * B * Hp
    bytes_accessed = B * D * 4 + D * N * 2 + 4 * (N + 3 * Hp) + B * 4

    def build(single_buffer_residents):
        return pl.pallas_call(
            functools.partial(_mlp_kernel, hp=Hp),
            out_shape=jax.ShapeDtypeStruct((B, 1), jnp.float32),
            grid=grid,
            in_specs=[
                pl.BlockSpec((TB, D), lambda i: (i, 0)),       # x batch tile
                resident((D, N), single_buffer_residents),     # fc1|fc2|fc4 w
                resident((1, N), single_buffer_residents),     # fused bias
                resident((1, Hp), single_buffer_residents),    # bn1 scale
                resident((1, Hp), single_buffer_residents),    # bn1 shift
                resident((1, Hp), single_buffer_residents),    # fc3 row
            ],
            out_specs=pl.BlockSpec((TB, 1), lambda i: (i, 0)),
            compiler_params=pltpu.CompilerParams(
                dimension_semantics=("parallel",),
                vmem_limit_bytes=vmem_limit),
            cost_estimate=pl.CostEstimate(
                flops=flops, transcendentals=2 * B * Hp,
                bytes_accessed=bytes_accessed),
        )

    args = (x, prepped["w12"], prepped["b12"], prepped["bn1s"],
            prepped["bn1h"], prepped["w3"])
    try:
        return build(True)(*args)
    except Exception:
        # pipeline_mode=pl.Buffered(1) unsupported on this jax version ->
        # fall back to default double-buffered resident specs.
        return build(False)(*args)


def init_params(key, input_dim, hidden_dim):
    ks = jax.random.split(key, 8)

    def linear_init(kw, kb, fan_in, fan_out):
        bound = 1.0 / jnp.sqrt(fan_in)
        w = jax.random.uniform(kw, (fan_out, fan_in), jnp.float32, -bound, bound)
        b = jax.random.uniform(kb, (fan_out,), jnp.float32, -bound, bound)
        return w, b

    fc1_w, fc1_b = linear_init(ks[0], ks[1], input_dim, hidden_dim)
    fc2_w, fc2_b = linear_init(ks[2], ks[3], input_dim, hidden_dim)
    fc3_w, fc3_b = linear_init(ks[4], ks[5], hidden_dim, 1)
    fc4_w, fc4_b = linear_init(ks[6], ks[7], input_dim, 1)

    def bn_init(n):
        return (jnp.ones((n,), jnp.float32),    # gamma
                jnp.zeros((n,), jnp.float32),   # beta
                jnp.zeros((n,), jnp.float32),   # running_mean
                jnp.ones((n,), jnp.float32))    # running_var

    return {
        "fc1_w": fc1_w, "fc1_b": fc1_b,
        "fc2_w": fc2_w, "fc2_b": fc2_b,
        "fc3_w": fc3_w, "fc3_b": fc3_b,
        "fc4_w": fc4_w, "fc4_b": fc4_b,
        "bn1": bn_init(hidden_dim),
        "bn2": bn_init(hidden_dim),
        "bn3": bn_init(1),
    }


def _ref_forward(x, params):
    """Pure-JAX f32 reference (eval-mode semantics)."""
    eps = 1e-5

    def bn(v, gamma, beta, mean, var):
        return (v - mean) / jnp.sqrt(var + eps) * gamma + beta

    def lin(v, w, b):
        return v @ w.T + b

    x1 = jax.nn.silu(lin(x, params["fc1_w"], params["fc1_b"]))
    x1 = bn(x1, *params["bn1"])
    x2 = bn(lin(x, params["fc2_w"], params["fc2_b"]), *params["bn2"])
    x3 = x1 * x2
    x4 = bn(lin(x3, params["fc3_w"], params["fc3_b"]), *params["bn3"])
    x5 = lin(x, params["fc4_w"], params["fc4_b"])
    return x4 + x5


if __name__ == "__main__":
    key = jax.random.PRNGKey(0)
    k_x, k_p = jax.random.split(key)

    B, INPUT_DIM, HIDDEN_DIM = 8, 16, 32
    x = jax.random.normal(k_x, (B, INPUT_DIM), jnp.float32)
    params = init_params(k_p, INPUT_DIM, HIDDEN_DIM)
    prepped = prepare_params(params)            # one-time weight prep

    out = jax.block_until_ready(mlp_forward(x, prepped))
    ref = _ref_forward(x, params)
    assert out.shape == (B, 1)
    # bf16 matmul operands (f32 accumulation) -> loosened tolerance vs f32 ref.
    assert jnp.allclose(out, ref, atol=5e-2, rtol=5e-2), (
        float(jnp.max(jnp.abs(out - ref))))

    # Second check: batch not a multiple of the tile -- exercises the
    # multi-step grid and the partial last block (no HBM padding of x).
    x_b = jax.random.normal(jax.random.PRNGKey(1), (21, INPUT_DIM), jnp.float32)
    out_b = jax.block_until_ready(mlp_forward(x_b, prepped))
    ref_b = _ref_forward(x_b, params)
    assert out_b.shape == (21, 1)
    assert jnp.allclose(out_b, ref_b, atol=5e-2, rtol=5e-2), (
        float(jnp.max(jnp.abs(out_b - ref_b))))

    print("KERNEL_OK")
</pallas_src>

<mosaic_0001>
module attributes {stable_mosaic.version = 11 : i64} {
  func.func @_mlp_kernel(%arg0: i32, %arg1: memref<8x16xf32, #tpu.memory_space<vmem>>, %arg2: memref<16x384xbf16, #tpu.memory_space<vmem>>, %arg3: memref<1x384xf32, #tpu.memory_space<vmem>>, %arg4: memref<1x128xf32, #tpu.memory_space<vmem>>, %arg5: memref<1x128xf32, #tpu.memory_space<vmem>>, %arg6: memref<1x128xf32, #tpu.memory_space<vmem>>, %arg7: memref<8x1xf32, #tpu.memory_space<vmem>>) attributes {dimension_semantics = [#tpu.dimension_semantics<parallel>], iteration_bounds = array<i64: 1>, scalar_prefetch = 0 : i64, scratch_operands = 0 : i64, tpu.core_type = #tpu.core_type<tc>, window_params = [{transform_indices = @transform_0, window_bounds = array<i64: 8, 16>}, {pipeline_mode = #tpu.pipeline_mode<synchronous>, transform_indices = @transform_1, window_bounds = array<i64: 16, 384>}, {pipeline_mode = #tpu.pipeline_mode<synchronous>, transform_indices = @transform_2, window_bounds = array<i64: 1, 384>}, {pipeline_mode = #tpu.pipeline_mode<synchronous>, transform_indices = @transform_3, window_bounds = array<i64: 1, 128>}, {pipeline_mode = #tpu.pipeline_mode<synchronous>, transform_indices = @transform_4, window_bounds = array<i64: 1, 128>}, {pipeline_mode = #tpu.pipeline_mode<synchronous>, transform_indices = @transform_5, window_bounds = array<i64: 1, 128>}, {transform_indices = @transform_6, window_bounds = array<i64: 8, 1>}]} {
    %c0 = arith.constant 0 : index
    %c0_0 = arith.constant 0 : index
    %0 = vector.load %arg1[%c0, %c0_0] : memref<8x16xf32, #tpu.memory_space<vmem>>, vector<8x16xf32>
    %1 = arith.truncf %0 : vector<8x16xf32> to vector<8x16xbf16>
    %c0_1 = arith.constant 0 : index
    %c0_2 = arith.constant 0 : index
    %2 = vector.load %arg2[%c0_1, %c0_2] : memref<16x384xbf16, #tpu.memory_space<vmem>>, vector<16x384xbf16>
    %cst = arith.constant dense<0.000000e+00> : vector<8x384xf32>
    %3 = tpu.matmul %1, %2, %cst {dimension_numbers = #tpu.dot_dimension_numbers<[1], [0], [0], [1], [0, 0, 1, 1], [], []>} : vector<8x16xbf16>, vector<16x384xbf16>, vector<8x384xf32> -> vector<8x384xf32>
    %c0_3 = arith.constant 0 : index
    %c0_4 = arith.constant 0 : index
    %4 = vector.load %arg3[%c0_3, %c0_4] : memref<1x384xf32, #tpu.memory_space<vmem>>, vector<1x384xf32>
    %5 = vector.broadcast %4 : vector<1x384xf32> to vector<8x384xf32>
    %6 = arith.addf %3, %5 : vector<8x384xf32>
    %7 = vector.extract_strided_slice %6 {offsets = [0, 0], sizes = [8, 128], strides = [1, 1]} : vector<8x384xf32> to vector<8x128xf32>
    %8 = vector.extract_strided_slice %6 {offsets = [0, 128], sizes = [8, 128], strides = [1, 1]} : vector<8x384xf32> to vector<8x128xf32>
    %9 = vector.extract_strided_slice %6 {offsets = [0, 256], sizes = [8, 1], strides = [1, 1]} : vector<8x384xf32> to vector<8x1xf32>
    %cst_5 = arith.constant 0.000000e+00 : f32
    %10 = vector.broadcast %cst_5 : f32 to vector<8x128xf32>
    %11 = arith.subf %10, %7 : vector<8x128xf32>
    %12 = math.exp %11 : vector<8x128xf32>
    %cst_6 = arith.constant 1.000000e+00 : f32
    %13 = vector.broadcast %cst_6 : f32 to vector<8x128xf32>
    %14 = arith.addf %13, %12 : vector<8x128xf32>
    %cst_7 = arith.constant 1.000000e+00 : f32
    %15 = vector.broadcast %cst_7 : f32 to vector<8x128xf32>
    %16 = arith.divf %15, %14 : vector<8x128xf32>
    %17 = arith.mulf %7, %16 : vector<8x128xf32>
    %c0_8 = arith.constant 0 : index
    %c0_9 = arith.constant 0 : index
    %18 = vector.load %arg4[%c0_8, %c0_9] : memref<1x128xf32, #tpu.memory_space<vmem>>, vector<1x128xf32>
    %19 = vector.broadcast %18 : vector<1x128xf32> to vector<8x128xf32>
    %20 = arith.mulf %17, %19 : vector<8x128xf32>
    %c0_10 = arith.constant 0 : index
    %c0_11 = arith.constant 0 : index
    %21 = vector.load %arg5[%c0_10, %c0_11] : memref<1x128xf32, #tpu.memory_space<vmem>>, vector<1x128xf32>
    %22 = vector.broadcast %21 : vector<1x128xf32> to vector<8x128xf32>
    %23 = arith.addf %20, %22 : vector<8x128xf32>
    %24 = arith.mulf %23, %8 : vector<8x128xf32>
    %c0_12 = arith.constant 0 : index
    %c0_13 = arith.constant 0 : index
    %25 = vector.load %arg6[%c0_12, %c0_13] : memref<1x128xf32, #tpu.memory_space<vmem>>, vector<1x128xf32>
    %26 = vector.broadcast %25 : vector<1x128xf32> to vector<8x128xf32>
    %27 = arith.mulf %24, %26 : vector<8x128xf32>
    %cst_14 = arith.constant dense<0.000000e+00> : vector<8xf32>
    %28 = vector.multi_reduction <add>, %27, %cst_14 [1] : vector<8x128xf32> to vector<8xf32>
    %29 = vector.shape_cast %28 : vector<8xf32> to vector<8x1xf32>
    %30 = arith.addf %29, %9 : vector<8x1xf32>
    %c0_15 = arith.constant 0 : index
    %c0_16 = arith.constant 0 : index
    %31 = vector.load %arg7[%c0_15, %c0_16] : memref<8x1xf32, #tpu.memory_space<vmem>>, vector<8x1xf32>
    tpu.vector_store %arg7[%c0_15, %c0_16], %30 {strides = array<i32>} : memref<8x1xf32, #tpu.memory_space<vmem>>, vector<8x1xf32>,
    return
  }
  func.func @transform_0(%arg0: i32) -> (i32, i32) {
    %c0_i32 = arith.constant 0 : i32
    %c0_i32_0 = arith.constant 0 : i32
    return %arg0, %c0_i32 : i32, i32
  }
  func.func @transform_1(%arg0: i32) -> (i32, i32) {
    %c0_i32 = arith.constant 0 : i32
    %c0_i32_0 = arith.constant 0 : i32
    %c0_i32_1 = arith.constant 0 : i32
    return %c0_i32, %c0_i32_0 : i32, i32
  }
  func.func @transform_2(%arg0: i32) -> (i32, i32) {
    %c0_i32 = arith.constant 0 : i32
    %c0_i32_0 = arith.constant 0 : i32
    %c0_i32_1 = arith.constant 0 : i32
    return %c0_i32, %c0_i32_0 : i32, i32
  }
  func.func @transform_3(%arg0: i32) -> (i32, i32) {
    %c0_i32 = arith.constant 0 : i32
    %c0_i32_0 = arith.constant 0 : i32
    %c0_i32_1 = arith.constant 0 : i32
    return %c0_i32, %c0_i32_0 : i32, i32
  }
  func.func @transform_4(%arg0: i32) -> (i32, i32) {
    %c0_i32 = arith.constant 0 : i32
    %c0_i32_0 = arith.constant 0 : i32
    %c0_i32_1 = arith.constant 0 : i32
    return %c0_i32, %c0_i32_0 : i32, i32
  }
  func.func @transform_5(%arg0: i32) -> (i32, i32) {
    %c0_i32 = arith.constant 0 : i32
    %c0_i32_0 = arith.constant 0 : i32
    %c0_i32_1 = arith.constant 0 : i32
    return %c0_i32, %c0_i32_0 : i32, i32
  }
  func.func @transform_6(%arg0: i32) -> (i32, i32) {
    %c0_i32 = arith.constant 0 : i32
    %c0_i32_0 = arith.constant 0 : i32
    return %arg0, %c0_i32 : i32, i32
  }
}

module attributes {stable_mosaic.version = 11 : i64} {
  func.func @_mlp_kernel(%arg0: i32, %arg1: memref<8x16xf32, #tpu.memory_space<vmem>>, %arg2: memref<16x384xbf16, #tpu.memory_space<vmem>>, %arg3: memref<1x384xf32, #tpu.memory_space<vmem>>, %arg4: memref<1x128xf32, #tpu.memory_space<vmem>>, %arg5: memref<1x128xf32, #tpu.memory_space<vmem>>, %arg6: memref<1x128xf32, #tpu.memory_space<vmem>>, %arg7: memref<8x1xf32, #tpu.memory_space<vmem>>) attributes {dimension_semantics = [#tpu.dimension_semantics<parallel>], iteration_bounds = array<i64: 1>, scalar_prefetch = 0 : i64, scratch_operands = 0 : i64, tpu.core_type = #tpu.core_type<tc>, window_params = [{transform_indices = @transform_0, window_bounds = array<i64: 8, 16>}, {pipeline_mode = #tpu.pipeline_mode<synchronous>, transform_indices = @transform_1, window_bounds = array<i64: 16, 384>}, {pipeline_mode = #tpu.pipeline_mode<synchronous>, transform_indices = @transform_2, window_bounds = array<i64: 1, 384>}, {pipeline_mode = #tpu.pipeline_mode<synchronous>, transform_indices = @transform_3, window_bounds = array<i64: 1, 128>}, {pipeline_mode = #tpu.pipeline_mode<synchronous>, transform_indices = @transform_4, window_bounds = array<i64: 1, 128>}, {pipeline_mode = #tpu.pipeline_mode<synchronous>, transform_indices = @transform_5, window_bounds = array<i64: 1, 128>}, {transform_indices = @transform_6, window_bounds = array<i64: 8, 1>}]} {
    %c0 = arith.constant 0 : index
    %c0_0 = arith.constant 0 : index
    %0 = vector.load %arg1[%c0, %c0_0] : memref<8x16xf32, #tpu.memory_space<vmem>>, vector<8x16xf32>
    %1 = arith.truncf %0 : vector<8x16xf32> to vector<8x16xbf16>
    %c0_1 = arith.constant 0 : index
    %c0_2 = arith.constant 0 : index
    %2 = vector.load %arg2[%c0_1, %c0_2] : memref<16x384xbf16, #tpu.memory_space<vmem>>, vector<16x384xbf16>
    %cst = arith.constant dense<0.000000e+00> : vector<8x384xf32>
    %3 = tpu.matmul %1, %2, %cst {dimension_numbers = #tpu.dot_dimension_numbers<[1], [0], [0], [1], [0, 0, 1, 1], [], []>} : vector<8x16xbf16>, vector<16x384xbf16>, vector<8x384xf32> -> vector<8x384xf32>
    %c0_3 = arith.constant 0 : index
    %c0_4 = arith.constant 0 : index
    %4 = vector.load %arg3[%c0_3, %c0_4] : memref<1x384xf32, #tpu.memory_space<vmem>>, vector<1x384xf32>
    %5 = vector.broadcast %4 : vector<1x384xf32> to vector<8x384xf32>
    %6 = arith.addf %3, %5 : vector<8x384xf32>
    %7 = vector.extract_strided_slice %6 {offsets = [0, 0], sizes = [8, 128], strides = [1, 1]} : vector<8x384xf32> to vector<8x128xf32>
    %8 = vector.extract_strided_slice %6 {offsets = [0, 128], sizes = [8, 128], strides = [1, 1]} : vector<8x384xf32> to vector<8x128xf32>
    %9 = vector.extract_strided_slice %6 {offsets = [0, 256], sizes = [8, 1], strides = [1, 1]} : vector<8x384xf32> to vector<8x1xf32>
    %cst_5 = arith.constant 0.000000e+00 : f32
    %10 = vector.broadcast %cst_5 : f32 to vector<8x128xf32>
    %11 = arith.subf %10, %7 : vector<8x128xf32>
    %12 = math.exp %11 : vector<8x128xf32>
    %cst_6 = arith.constant 1.000000e+00 : f32
    %13 = vector.broadcast %cst_6 : f32 to vector<8x128xf32>
    %14 = arith.addf %13, %12 : vector<8x128xf32>
    %cst_7 = arith.constant 1.000000e+00 : f32
    %15 = vector.broadcast %cst_7 : f32 to vector<8x128xf32>
    %16 = arith.divf %15, %14 : vector<8x128xf32>
    %17 = arith.mulf %7, %16 : vector<8x128xf32>
    %c0_8 = arith.constant 0 : index
    %c0_9 = arith.constant 0 : index
    %18 = vector.load %arg4[%c0_8, %c0_9] : memref<1x128xf32, #tpu.memory_space<vmem>>, vector<1x128xf32>
    %19 = vector.broadcast %18 : vector<1x128xf32> to vector<8x128xf32>
    %20 = arith.mulf %17, %19 : vector<8x128xf32>
    %c0_10 = arith.constant 0 : index
    %c0_11 = arith.constant 0 : index
    %21 = vector.load %arg5[%c0_10, %c0_11] : memref<1x128xf32, #tpu.memory_space<vmem>>, vector<1x128xf32>
    %22 = vector.broadcast %21 : vector<1x128xf32> to vector<8x128xf32>
    %23 = arith.addf %20, %22 : vector<8x128xf32>
    %24 = arith.mulf %23, %8 : vector<8x128xf32>
    %c0_12 = arith.constant 0 : index
    %c0_13 = arith.constant 0 : index
    %25 = vector.load %arg6[%c0_12, %c0_13] : memref<1x128xf32, #tpu.memory_space<vmem>>, vector<1x128xf32>
    %26 = vector.broadcast %25 : vector<1x128xf32> to vector<8x128xf32>
    %27 = arith.mulf %24, %26 : vector<8x128xf32>
    %cst_14 = arith.constant dense<0.000000e+00> : vector<8xf32>
    %28 = vector.multi_reduction <add>, %27, %cst_14 [1] : vector<8x128xf32> to vector<8xf32>
    %29 = vector.shape_cast %28 : vector<8xf32> to vector<8x1xf32>
    %30 = arith.addf %29, %9 : vector<8x1xf32>
    %c0_15 = arith.constant 0 : index
    %c0_16 = arith.constant 0 : index
    %31 = vector.load %arg7[%c0_15, %c0_16] : memref<8x1xf32, #tpu.memory_space<vmem>>, vector<8x1xf32>
    tpu.vector_store %arg7[%c0_15, %c0_16], %30 {strides = array<i32>} : memref<8x1xf32, #tpu.memory_space<vmem>>, vector<8x1xf32>,
    return
  }
  func.func @transform_0(%arg0: i32) -> (i32, i32) {
    %c0_i32 = arith.constant 0 : i32
    %c0_i32_0 = arith.constant 0 : i32
    return %arg0, %c0_i32 : i32, i32
  }
  func.func @transform_1(%arg0: i32) -> (i32, i32) {
    %c0_i32 = arith.constant 0 : i32
    %c0_i32_0 = arith.constant 0 : i32
    %c0_i32_1 = arith.constant 0 : i32
    return %c0_i32, %c0_i32_0 : i32, i32
  }
  func.func @transform_2(%arg0: i32) -> (i32, i32) {
    %c0_i32 = arith.constant 0 : i32
    %c0_i32_0 = arith.constant 0 : i32
    %c0_i32_1 = arith.constant 0 : i32
    return %c0_i32, %c0_i32_0 : i32, i32
  }
  func.func @transform_3(%arg0: i32) -> (i32, i32) {
    %c0_i32 = arith.constant 0 : i32
    %c0_i32_0 = arith.constant 0 : i32
    %c0_i32_1 = arith.constant 0 : i32
    return %c0_i32, %c0_i32_0 : i32, i32
  }
  func.func @transform_4(%arg0: i32) -> (i32, i32) {
    %c0_i32 = arith.constant 0 : i32
    %c0_i32_0 = arith.constant 0 : i32
    %c0_i32_1 = arith.constant 0 : i32
    return %c0_i32, %c0_i32_0 : i32, i32
  }
  func.func @transform_5(%arg0: i32) -> (i32, i32) {
    %c0_i32 = arith.constant 0 : i32
    %c0_i32_0 = arith.constant 0 : i32
    %c0_i32_1 = arith.constant 0 : i32
    return %c0_i32, %c0_i32_0 : i32, i32
  }
  func.func @transform_6(%arg0: i32) -> (i32, i32) {
    %c0_i32 = arith.constant 0 : i32
    %c0_i32_0 = arith.constant 0 : i32
    return %arg0, %c0_i32 : i32, i32
  }
}

</mosaic_0001>

<bundles_post_ra>
// kernel: tpu_custom_call.1
= control target key start
LH: loop header
LB: loop body
LE: loop exit
PB: predicated region body
PF: predicated region fallthrough
CT: control target
= control target key end

     0   :  { %11 = vsyncpa [#allocation3], 0  ;;  %s384_s0 = inlined_call_operand.hbm [shape: f32[8,16], index: 0, kind: input, shape index: {}]   ;;  %s385_s1 = inlined_call_operand.hbm [shape: bf16[16,384], index: 1, kind: input, shape index: {}]   ;;  %s386_s2 = inlined_call_operand.vmem [shape: f32[1,384], index: 2, kind: input, shape index: {}]   ;;  %s387_s3 = inlined_call_operand.vmem [shape: f32[1,128], index: 3, kind: input, shape index: {}]   ;;  %s388_s4 = inlined_call_operand.vmem [shape: f32[1,128], index: 4, kind: input, shape index: {}]   ;;  %s389_s5 = inlined_call_operand.vmem [shape: f32[1,128], index: 5, kind: input, shape index: {}]   ;;  %s390_s6 = inlined_call_operand.vmem [shape: f32[8,1], index: 6, kind: output, shape index: {}]  }
   0x1   :  { %12 = vsyncpa [#allocation5], 0  ;;  %s296_s21 = smov [#allocation2]   ;;  %s297_s23 = smov [#allocation4]  }
   0x2   :  { %s19_s22 = sshll.u32 %s296_s21, 4  ;;  %s28_s24 = sshll.u32 %s297_s23, 4  ;;  %s20_s22 = int_to_ptr.vmem [resolvable:$true] %s19_s22  ;;  %s338_s24 = int_to_ptr.vmem [resolvable:$true] %s28_s24 }
   0x3   :  { %s248_s27 = scalar_lea.hbm %s384_s0, 128 }
   0x4   :  { %p249_p0 = scmp.ne.s32.totalorder %s384_s0, %s248_s27  ;;  %p252_p1 = scmp.lt.u32.totalorder %s248_s27, %s384_s0 }
   0x6   :  { %p254_p2 = pnand %p252_p1, %p249_p0 }
   0x8   :  { %257 = shalt.err (!%p254_p2)
}
   0x9   :  { %s258_s8 = scalar_lea.vmem %s20_s22, 128  ;;  %p263_p4 = scmp.lt.s32.totalorder %s20_s22, %s20_s22 }
   0xa   :  { %p259_p3 = scmp.ne.s32.totalorder %s20_s22, %s258_s8  ;;  %p264_p5 = scmp.lt.s32.totalorder %s258_s8, %s258_s8 }
   0xc   :  { %p265_p6 = por %p264_p5, %p263_p4 }
   0xe   :  { %p266_p7 = pnand %p265_p6, %p259_p3 }
  0x10   :  { %269 = shalt.err (!%p266_p7)
}
  0x11   :  { %22 = dma.hbm_to_vmem [thread:$0]  %s384_s0, 128, %s20_s22, [#allocation3]  }
  0x12   :  { %s270_s13 = scalar_lea.hbm %s385_s1, 384 }
  0x13   :  { %p271_p8 = scmp.ne.s32.totalorder %s385_s1, %s270_s13  ;;  %p274_p9 = scmp.lt.u32.totalorder %s270_s13, %s385_s1 }
  0x15   :  { %p276_p10 = pnand %p274_p9, %p271_p8 }
  0x17   :  { %279 = shalt.err (!%p276_p10)
}
  0x18   :  { %s280_s18 = scalar_lea.vmem %s338_s24, 384  ;;  %p285_p12 = scmp.lt.s32.totalorder %s338_s24, %s338_s24 }
  0x19   :  { %p281_p11 = scmp.ne.s32.totalorder %s338_s24, %s280_s18  ;;  %p286_p13 = scmp.lt.s32.totalorder %s280_s18, %s280_s18 }
  0x1b   :  { %p287_p0 = por %p286_p13, %p285_p12 }
  0x1d   :  { %p288_p1 = pnand %p287_p0, %p281_p11 }
  0x1f   :  { %291 = shalt.err (!%p288_p1)
}
  0x20   :  { %s298_s0 = smov 192   ;;  %s299_s19 = smov 12  }
  0x21   :  { %34 = dma.hbm_to_vmem [thread:$0]  %s385_s1, 384, %s338_s24, [#allocation5], %s298_s0, %s298_s0, %s299_s19  }
  0x22   :  { %292 = dma.done.wait [#allocation3], 128  }
  0x23   :  { %293 = vsyncadd [#allocation3], 4294967168 }
  0x24   :  { %294 = dma.done.wait [#allocation5], 384  }
  0x25   :  { %295 = vsyncadd [#allocation5], 4294966912  ;;  %v300_v0 = vmov 0   ;;  %v301_v1 = vmov 0.0   ;;  %vm302_vm0 = vmmov 0   ;;  %v50_v4 = vld [vmem:[#allocation2] sm:$0xff]  ;;  %v58_v7 = vlaneseq }
  0x26   :  { %125 = vmatprep.mubr.bf16.mxu0 %v300_v0  ;;  %227 = vmatprep.subr.bf16.mxu1 %v301_v1  ;;  %v240_v2 = vld [vmem:[#allocation4 + $0x4] ss:$12 sps:$4 sm:$0xff]   ;;  %v242_v3 = vld [vmem:[#allocation4] ss:$12 sps:$4 sm:$0xff]   ;;  %v51_v5 = vpack.c.bf16 %v50_v4, %v50_v4  ;;  %v243_v6 = vld [vmem:[#allocation4 + $0x8] ss:$12 sps:$4 sm:$0xff]  }
  0x27   :  { %229 = vmatprep.mubr.msk.bf16.mxu1 %vm302_vm0, %v301_v1  ;;  %93 = vmatprep.subr.bf16.mxu0 %v240_v2  ;;  %vm89_vm1 = vcmask 130048   ;;  %v59_v8 = vshrl.u32 %v58_v7, 7  ;;  %v56_v10 = vld [vmem:[%s386_s2] sm:$0x7]  ;;  %vm209_vm2 = vcmask 7168  }
  0x28   :  { %94 = vmatpush1.bf16.msra.mxu0 %v242_v3  ;;  %228 = vmatpush3.bf16.msra.mxu1 %v243_v6  ;;  %v222_v27 = vld [vmem:[%s387_s3] ss:$0 sm:$0xff] }
  0x29   :  { %v60_v9 = vsub.s32 0, %v59_v8  ;;  %v64_v25 = vsub.s32 1, %v59_v8  ;;  %v223_v30 = vld [vmem:[%s388_s4] ss:$0 sm:$0xff]  ;;  %v68_v37 = vsub.s32 2, %v59_v8 }
  0x2a   :  { %v224_v34 = vld [vmem:[%s389_s5] ss:$0 sm:$0xff] }
  0x2b   :  { %220 = vmatmul.mubr.msk.bf16.vlgmr.msra.gmra.mrb[0].mxu0 %vm89_vm1, %v51_v5  ;;  %230 = vmatmul.mubr.msk.bf16.vlgmr.msra.gmra.mrb[0].mxu1 %vm89_vm1, %v51_v5  ;;  %v61_v11 = vrot.slane %v56_v10, %v60_v9  ;;  %v65_v29 = vrot.slane %v56_v10, %v64_v25  ;;  %v69_v38 = vrot.slane %v56_v10, %v68_v37 }
  0xfe   :  { %v127_v12 = vpop.f32.mrb[0].mxu0  ;;  %v168_v15 = vpop.f32.mrb[0].mxu1 }
  0xff   :  { %v128_v13 = vadd.f32 %v127_v12, %v61_v11  ;;  %v129_v14 = vpop.f32.mrb[1].mxu0  ;;  %v231_v17 = vpop.f32.mrb[1].mxu1  ;;  %v169_v39 = vadd.f32 %v168_v15, %v69_v38 }
 0x100   :  { %v131_v16 = vpop.f32.mrb[2].mxu0  ;;  %v171_v20 = vpop.f32.mrb[2].mxu1  ;;  %v130_v32 = vadd.f32 %v129_v14, %v65_v29 }
 0x101   :  { %v174_v18 = vsub.f32 0.0, %v128_v13  ;;  %v132_v19 = vpop.f32.mrb[3].mxu0  ;;  %v232_v21 = vpop.f32.mrb[3].mxu1 }
 0x103   :  { %v175_v22 = vmul.f32 1.442695, %v174_v18 }
 0x105   :  { %244 = vpow2.f32 %v175_v22 }
 0x10f   :  { %v245_v23 = vpop.eup %244 }
 0x110   :  { %v177_v24 = vadd.f32 1.0, %v245_v23 }
 0x112   :  { %246 = vrcp.f32 %v177_v24 }
 0x11c   :  { %v247_v26 = vpop.eup %246 }
 0x11d   :  { %v180_v28 = vmul.f32 %v247_v26, %v128_v13 }
 0x11f   :  { %v188_v31 = vmul.f32 %v222_v27, %v180_v28 }
 0x121   :  { %v196_v33 = vadd.f32 %v223_v30, %v188_v31 }
 0x123   :  { %v197_v35 = vmul.f32 %v196_v33, %v130_v32 }
 0x125   :  { %v205_v36 = vmul.f32 %v224_v34, %v197_v35 }
 0x127   :  { %206 = vadd.xlane.f32.xlu0 %v205_v36 }
 0x1b4   :  { %v207_v40 = vpop.xlane.xlu0 %206 }
 0x1b5   :  { %v208_v41 = vadd.f32 %v207_v40, %v169_v39 }
 0x1b7   :  { %210 = vst.msk [vmem:[%s390_s6] sm:$0xff] %vm209_vm2, %v208_v41 }
 0x1b8   :  { %215 = vsyncpa [#allocation3], 1 }
 0x1b9   :  { %216 = vsyncpa [#allocation5], 1 }

// kernel: tpu_custom_call.1
= control target key start
LH: loop header
LB: loop body
LE: loop exit
PB: predicated region body
PF: predicated region fallthrough
CT: control target
= control target key end

     0   :  { %11 = vsyncpa [#allocation3], 0  ;;  %s384_s0 = inlined_call_operand.hbm [shape: f32[8,16], index: 0, kind: input, shape index: {}]   ;;  %s385_s1 = inlined_call_operand.hbm [shape: bf16[16,384], index: 1, kind: input, shape index: {}]   ;;  %s386_s2 = inlined_call_operand.vmem [shape: f32[1,384], index: 2, kind: input, shape index: {}]   ;;  %s387_s3 = inlined_call_operand.vmem [shape: f32[1,128], index: 3, kind: input, shape index: {}]   ;;  %s388_s4 = inlined_call_operand.vmem [shape: f32[1,128], index: 4, kind: input, shape index: {}]   ;;  %s389_s5 = inlined_call_operand.vmem [shape: f32[1,128], index: 5, kind: input, shape index: {}]   ;;  %s390_s6 = inlined_call_operand.vmem [shape: f32[8,1], index: 6, kind: output, shape index: {}]  }
   0x1   :  { %12 = vsyncpa [#allocation5], 0  ;;  %s296_s21 = smov [#allocation2]   ;;  %s297_s23 = smov [#allocation4]  }
   0x2   :  { %s19_s22 = sshll.u32 %s296_s21, 4  ;;  %s28_s24 = sshll.u32 %s297_s23, 4  ;;  %s20_s22 = int_to_ptr.vmem [resolvable:$true] %s19_s22  ;;  %s338_s24 = int_to_ptr.vmem [resolvable:$true] %s28_s24 }
   0x3   :  { %s248_s27 = scalar_lea.hbm %s384_s0, 128 }
   0x4   :  { %p249_p0 = scmp.ne.s32.totalorder %s384_s0, %s248_s27  ;;  %p252_p1 = scmp.lt.u32.totalorder %s248_s27, %s384_s0 }
   0x6   :  { %p254_p2 = pnand %p252_p1, %p249_p0 }
   0x8   :  { %257 = shalt.err (!%p254_p2)
}
   0x9   :  { %s258_s8 = scalar_lea.vmem %s20_s22, 128  ;;  %p263_p4 = scmp.lt.s32.totalorder %s20_s22, %s20_s22 }
   0xa   :  { %p259_p3 = scmp.ne.s32.totalorder %s20_s22, %s258_s8  ;;  %p264_p5 = scmp.lt.s32.totalorder %s258_s8, %s258_s8 }
   0xc   :  { %p265_p6 = por %p264_p5, %p263_p4 }
   0xe   :  { %p266_p7 = pnand %p265_p6, %p259_p3 }
  0x10   :  { %269 = shalt.err (!%p266_p7)
}
  0x11   :  { %22 = dma.hbm_to_vmem [thread:$0]  %s384_s0, 128, %s20_s22, [#allocation3]  }
  0x12   :  { %s270_s13 = scalar_lea.hbm %s385_s1, 384 }
  0x13   :  { %p271_p8 = scmp.ne.s32.totalorder %s385_s1, %s270_s13  ;;  %p274_p9 = scmp.lt.u32.totalorder %s270_s13, %s385_s1 }
  0x15   :  { %p276_p10 = pnand %p274_p9, %p271_p8 }
  0x17   :  { %279 = shalt.err (!%p276_p10)
}
  0x18   :  { %s280_s18 = scalar_lea.vmem %s338_s24, 384  ;;  %p285_p12 = scmp.lt.s32.totalorder %s338_s24, %s338_s24 }
  0x19   :  { %p281_p11 = scmp.ne.s32.totalorder %s338_s24, %s280_s18  ;;  %p286_p13 = scmp.lt.s32.totalorder %s280_s18, %s280_s18 }
  0x1b   :  { %p287_p0 = por %p286_p13, %p285_p12 }
  0x1d   :  { %p288_p1 = pnand %p287_p0, %p281_p11 }
  0x1f   :  { %291 = shalt.err (!%p288_p1)
}
  0x20   :  { %s298_s0 = smov 192   ;;  %s299_s19 = smov 12  }
  0x21   :  { %34 = dma.hbm_to_vmem [thread:$0]  %s385_s1, 384, %s338_s24, [#allocation5], %s298_s0, %s298_s0, %s299_s19  }
  0x22   :  { %292 = dma.done.wait [#allocation3], 128  }
  0x23   :  { %293 = vsyncadd [#allocation3], 4294967168 }
  0x24   :  { %294 = dma.done.wait [#allocation5], 384  }
  0x25   :  { %295 = vsyncadd [#allocation5], 4294966912  ;;  %v300_v0 = vmov 0   ;;  %v301_v1 = vmov 0.0   ;;  %vm302_vm0 = vmmov 0   ;;  %v50_v4 = vld [vmem:[#allocation2] sm:$0xff]  ;;  %v58_v7 = vlaneseq }
  0x26   :  { %125 = vmatprep.mubr.bf16.mxu0 %v300_v0  ;;  %227 = vmatprep.subr.bf16.mxu1 %v301_v1  ;;  %v240_v2 = vld [vmem:[#allocation4 + $0x4] ss:$12 sps:$4 sm:$0xff]   ;;  %v242_v3 = vld [vmem:[#allocation4] ss:$12 sps:$4 sm:$0xff]   ;;  %v51_v5 = vpack.c.bf16 %v50_v4, %v50_v4  ;;  %v243_v6 = vld [vmem:[#allocation4 + $0x8] ss:$12 sps:$4 sm:$0xff]  }
  0x27   :  { %229 = vmatprep.mubr.msk.bf16.mxu1 %vm302_vm0, %v301_v1  ;;  %93 = vmatprep.subr.bf16.mxu0 %v240_v2  ;;  %vm89_vm1 = vcmask 130048   ;;  %v59_v8 = vshrl.u32 %v58_v7, 7  ;;  %v56_v10 = vld [vmem:[%s386_s2] sm:$0x7]  ;;  %vm209_vm2 = vcmask 7168  }
  0x28   :  { %94 = vmatpush1.bf16.msra.mxu0 %v242_v3  ;;  %228 = vmatpush3.bf16.msra.mxu1 %v243_v6  ;;  %v222_v27 = vld [vmem:[%s387_s3] ss:$0 sm:$0xff] }
  0x29   :  { %v60_v9 = vsub.s32 0, %v59_v8  ;;  %v64_v25 = vsub.s32 1, %v59_v8  ;;  %v223_v30 = vld [vmem:[%s388_s4] ss:$0 sm:$0xff]  ;;  %v68_v37 = vsub.s32 2, %v59_v8 }
  0x2a   :  { %v224_v34 = vld [vmem:[%s389_s5] ss:$0 sm:$0xff] }
  0x2b   :  { %220 = vmatmul.mubr.msk.bf16.vlgmr.msra.gmra.mrb[0].mxu0 %vm89_vm1, %v51_v5  ;;  %230 = vmatmul.mubr.msk.bf16.vlgmr.msra.gmra.mrb[0].mxu1 %vm89_vm1, %v51_v5  ;;  %v61_v11 = vrot.slane %v56_v10, %v60_v9  ;;  %v65_v29 = vrot.slane %v56_v10, %v64_v25  ;;  %v69_v38 = vrot.slane %v56_v10, %v68_v37 }
  0xfe   :  { %v127_v12 = vpop.f32.mrb[0].mxu0  ;;  %v168_v15 = vpop.f32.mrb[0].mxu1 }
  0xff   :  { %v128_v13 = vadd.f32 %v127_v12, %v61_v11  ;;  %v129_v14 = vpop.f32.mrb[1].mxu0  ;;  %v231_v17 = vpop.f32.mrb[1].mxu1  ;;  %v169_v39 = vadd.f32 %v168_v15, %v69_v38 }
 0x100   :  { %v131_v16 = vpop.f32.mrb[2].mxu0  ;;  %v171_v20 = vpop.f32.mrb[2].mxu1  ;;  %v130_v32 = vadd.f32 %v129_v14, %v65_v29 }
 0x101   :  { %v174_v18 = vsub.f32 0.0, %v128_v13  ;;  %v132_v19 = vpop.f32.mrb[3].mxu0  ;;  %v232_v21 = vpop.f32.mrb[3].mxu1 }
 0x103   :  { %v175_v22 = vmul.f32 1.442695, %v174_v18 }
 0x105   :  { %244 = vpow2.f32 %v175_v22 }
 0x10f   :  { %v245_v23 = vpop.eup %244 }
 0x110   :  { %v177_v24 = vadd.f32 1.0, %v245_v23 }
 0x112   :  { %246 = vrcp.f32 %v177_v24 }
 0x11c   :  { %v247_v26 = vpop.eup %246 }
 0x11d   :  { %v180_v28 = vmul.f32 %v247_v26, %v128_v13 }
 0x11f   :  { %v188_v31 = vmul.f32 %v222_v27, %v180_v28 }
 0x121   :  { %v196_v33 = vadd.f32 %v223_v30, %v188_v31 }
 0x123   :  { %v197_v35 = vmul.f32 %v196_v33, %v130_v32 }
 0x125   :  { %v205_v36 = vmul.f32 %v224_v34, %v197_v35 }
 0x127   :  { %206 = vadd.xlane.f32.xlu0 %v205_v36 }
 0x1b4   :  { %v207_v40 = vpop.xlane.xlu0 %206 }
 0x1b5   :  { %v208_v41 = vadd.f32 %v207_v40, %v169_v39 }
 0x1b7   :  { %210 = vst.msk [vmem:[%s390_s6] sm:$0xff] %vm209_vm2, %v208_v41 }
 0x1b8   :  { %215 = vsyncpa [#allocation3], 1 }
 0x1b9   :  { %216 = vsyncpa [#allocation5], 1 }

</bundles_post_ra>
